<compile_context>
chip_gen: v6e
topology: v6e:2x2x1
jax: 0.10.0
libtpu: 0.0.40
codegen_flags: <defaults>
</compile_context>

<pallas_src>
import functools
import math

import jax
import jax.numpy as jnp
from jax.experimental import pallas as pl
from jax.experimental.pallas import tpu as pltpu


def _round_up(a: int, b: int) -> int:
    return ((a + b - 1) // b) * b


# --------------------------------------------------------------------------- #
# Device knobs / tile planning
# --------------------------------------------------------------------------- #
def _device_knobs():
    try:
        kind = jax.devices()[0].device_kind.lower()
    except Exception:
        kind = ""
    big_vmem = ("v5" in kind) or ("v6" in kind)            # 128 MiB VMEM parts
    two_cores = ("v7" in kind) or ("7x" in kind)           # v7x: 2 TCs, 64 MiB VMEM
    lane_floor = 128 if "v5" in kind else 256              # MXU lane-width floor
    if big_vmem:
        budget, vmem_cap = 64 << 20, 96 << 20
    else:                                                   # v7x / unknown: conservative
        budget, vmem_cap = 34 << 20, 42 << 20
    return budget, vmem_cap, lane_floor, two_cores


def _tn_options(vocab, lane_floor):
    vocab128 = _round_up(vocab, 128)
    opts = [c for c in (4096, 2048, 1024, 512, 256, 128) if c <= vocab128]
    if not opts:
        opts = [vocab128]
    wide = [c for c in opts if c >= lane_floor]
    return wide if wide else opts


def _tm_options(n, row_g, two_cores):
    n_pad = _round_up(max(n, 1), row_g)
    cands = {t for t in (1024, 512, 256, 128, 64, 32, 16, 8)
             if t % row_g == 0 and t <= n_pad}
    if n_pad <= 1024:
        cands.add(n_pad)
    cands = sorted(cands, reverse=True) or [n_pad]
    if two_cores and n > row_g:
        pref = [t for t in cands if -(-n // t) >= 2]       # keep both TensorCores busy
        if pref:
            cands = pref
    return cands


_MAX_FUSED_VOCAB_TILES = 64   # bound for the statically unrolled rescale loop


def _plan(n, d_model, vocab, x_bytes, w_bytes, out_bytes,
          budget, lane_floor, row_g, two_cores, force_two_pass):
    """Pick (mode, tm, tn, pv); mode in {"fused", "two_pass"}."""
    tn_opts = _tn_options(vocab, lane_floor)
    tm_opts = _tm_options(n, row_g, two_cores)

    if not force_two_pass:
        for tm in tm_opts:                 # larger tm first: weight-tile reuse
            for tn in tn_opts:             # larger tn first: fewer steps, full MXU width
                pv = _round_up(vocab, tn)
                nj = pv // tn
                if nj > _MAX_FUSED_VOCAB_TILES:
                    continue
                need = (2 * tm * d_model * x_bytes      # x tile (double buffered)
                        + 2 * d_model * tn * w_bytes    # streamed weight tile
                        + 2 * tn * 4                    # bias tile
                        + 2 * tm * pv * out_bytes       # resident output row-slab
                        + tm * pv * 4                   # exp(logits - m) VMEM slab
                        + (nj + 2) * tm * 128 * 4)      # m history + (m, l) (lane padded)
                if need <= budget:
                    return "fused", tm, tn, pv

    for tm in tm_opts:
        for tn in tn_opts:
            need = (2 * tm * d_model * x_bytes
                    + 2 * d_model * tn * w_bytes
                    + 2 * tn * 4
                    + 2 * tm * tn * 4                   # f32 logits tile (output)
                    + 6 * tm * 128 * 4)                 # (m, l) outputs + scratch
            if need <= budget:
                return "two_pass", tm, tn, _round_up(vocab, tn)

    # Nothing fits the budget (enormous d_model): smallest tiles, rely on the
    # vmem limit.  TODO(synk): split d_model over a K grid axis with an f32
    # accumulator here instead of shrinking tn.
    return "two_pass", tm_opts[-1], tn_opts[-1], _round_up(vocab, tn_opts[-1])


# --------------------------------------------------------------------------- #
# Fused single-pass kernel: logits never leave VMEM
# --------------------------------------------------------------------------- #
def _fused_kernel(nj, tn, x_ref, w_ref, b_ref, o_ref, p_sc, mh_sc, m_sc, l_sc):
    # x_ref : (tm, d_model)   resident across the vocab axis
    # w_ref : (d_model, tn)   streamed over vocab tiles
    # b_ref : (1, tn)
    # o_ref : (tm, pv)        resident; written once at the last vocab tile
    # p_sc  : (nj, tm, tn)    exp(logits - running max) per vocab tile
    # mh_sc : (nj, tm, 1)     running-max snapshot per vocab tile
    # m_sc/l_sc : (tm, 1)     online softmax statistics
    j = pl.program_id(1)

    @pl.when(j == 0)
    def _():
        m_sc[...] = jnp.full_like(m_sc, -jnp.inf)
        l_sc[...] = jnp.zeros_like(l_sc)

    logits = jnp.dot(x_ref[...], w_ref[...], preferred_element_type=jnp.float32)
    logits = logits + b_ref[...].astype(jnp.float32)

    m_prev = m_sc[...]
    m_new = jnp.maximum(m_prev, jnp.max(logits, axis=-1, keepdims=True))
    p = jnp.exp(logits - m_new)            # EUP work hidden under the MXU sweep
    l_sc[...] = l_sc[...] * jnp.exp(m_prev - m_new) + jnp.sum(p, axis=-1, keepdims=True)
    m_sc[...] = m_new
    p_sc[j] = p                            # numerators stay in VMEM (no HBM round trip)
    mh_sc[j] = m_new

    @pl.when(j == nj - 1)
    def _():
        m_fin = m_sc[...]
        inv_l = pl.reciprocal(l_sc[...], approx=False)
        for jj in range(nj):               # static unroll; nj <= 64 by planning
            scale = jnp.exp(mh_sc[jj] - m_fin) * inv_l
            o_ref[:, jj * tn:(jj + 1) * tn] = (p_sc[jj] * scale).astype(o_ref.dtype)


# --------------------------------------------------------------------------- #
# Two-pass fallback (very large tm x pv slabs)
# --------------------------------------------------------------------------- #
def _logits_stats_kernel(x_ref, w_ref, b_ref, logits_ref, m_ref, l_ref, m_sc, l_sc):
    j = pl.program_id(1)

    @pl.when(j == 0)
    def _():
        m_sc[...] = jnp.full_like(m_sc, -jnp.inf)
        l_sc[...] = jnp.zeros_like(l_sc)

    logits = jnp.dot(x_ref[...], w_ref[...], preferred_element_type=jnp.float32)
    logits = logits + b_ref[...].astype(jnp.float32)
    logits_ref[...] = logits

    m_prev = m_sc[...]
    m_new = jnp.maximum(m_prev, jnp.max(logits, axis=-1, keepdims=True))
    l_sc[...] = (l_sc[...] * jnp.exp(m_prev - m_new)
                 + jnp.sum(jnp.exp(logits - m_new), axis=-1, keepdims=True))
    m_sc[...] = m_new

    @pl.when(j == pl.num_programs(1) - 1)
    def _():
        m_ref[...] = m_sc[...]
        l_ref[...] = l_sc[...]


def _normalize_kernel(logits_ref, m_ref, l_ref, o_ref):
    e = jnp.exp(logits_ref[...] - m_ref[...])
    o_ref[...] = (e * pl.reciprocal(l_ref[...], approx=False)).astype(o_ref.dtype)


# --------------------------------------------------------------------------- #
# Wrapper
# --------------------------------------------------------------------------- #
def output_generator(x, weight_t, bias, *, compute_dtype=None, force_two_pass=False):
    """Softmax(x @ weight_t + bias, axis=-1).

    x:        (..., d_model)
    weight_t: (d_model, vocab)   (transpose of PyTorch's (vocab, d_model) weight)
    bias:     (vocab,)
    compute_dtype: optionally cast x / weight_t (e.g. jnp.bfloat16) for the MXU.
    """
    orig_shape = x.shape
    d_model = orig_shape[-1]
    vocab = weight_t.shape[-1]
    out_dtype = x.dtype

    x2 = x.reshape(-1, d_model)
    wt = weight_t
    if compute_dtype is not None:
        x2 = x2.astype(compute_dtype)
        wt = wt.astype(compute_dtype)
    n = x2.shape[0]

    x_bytes = jnp.dtype(x2.dtype).itemsize
    w_bytes = jnp.dtype(wt.dtype).itemsize
    out_bytes = jnp.dtype(out_dtype).itemsize
    row_g = max(8, 32 // x_bytes)          # sublane packing: 8 rows f32, 16 rows bf16

    budget, vmem_cap, lane_floor, two_cores = _device_knobs()
    mode, tm, tn, pv = _plan(n, d_model, vocab, x_bytes, w_bytes, out_bytes,
                             budget, lane_floor, row_g, two_cores, force_two_pass)
    pn = _round_up(n, tm)
    nj = pv // tn

    # Pad rows / vocab columns instead of asserting divisibility.  Padded vocab
    # columns get a -1e30 bias -> exp underflows to 0, so they never contribute
    # to the softmax denominator.
    if pn != n:
        x2 = jnp.pad(x2, ((0, pn - n), (0, 0)))
    b = bias
    if pv != vocab:
        wt = jnp.pad(wt, ((0, 0), (0, pv - vocab)))
        b = jnp.pad(b, (0, pv - vocab), constant_values=-1e30)
    b2 = b.reshape(1, pv).astype(jnp.float32)

    grid = (pn // tm, nj)

    if mode == "fused":
        cost = pl.CostEstimate(
            flops=2 * pn * d_model * pv,
            transcendentals=2 * pn * pv,
            bytes_accessed=int(pn * d_model * x_bytes
                               + (pn // tm) * (d_model * pv * w_bytes + pv * 4)
                               + pn * pv * out_bytes),
        )
        out = pl.pallas_call(
            functools.partial(_fused_kernel, nj, tn),
            out_shape=jax.ShapeDtypeStruct((pn, pv), out_dtype),
            grid_spec=pltpu.PrefetchScalarGridSpec(
                num_scalar_prefetch=0,
                grid=grid,
                in_specs=[
                    pl.BlockSpec((tm, d_model), lambda i, j: (i, 0)),
                    pl.BlockSpec((d_model, tn), lambda i, j: (0, j)),
                    pl.BlockSpec((1, tn), lambda i, j: (0, j)),
                ],
                out_specs=pl.BlockSpec((tm, pv), lambda i, j: (i, 0)),
                scratch_shapes=[
                    pltpu.VMEM((nj, tm, tn), jnp.float32),   # exp(logits - m) slab
                    pltpu.VMEM((nj, tm, 1), jnp.float32),    # running-max history
                    pltpu.VMEM((tm, 1), jnp.float32),        # m
                    pltpu.VMEM((tm, 1), jnp.float32),        # l
                ],
            ),
            compiler_params=pltpu.CompilerParams(
                dimension_semantics=("parallel", "arbitrary"),
                vmem_limit_bytes=vmem_cap,
            ),
            cost_estimate=cost,
        )(x2, wt, b2)
    else:
        # ---- Pass 1: streamed logits + online softmax statistics ----
        cost1 = pl.CostEstimate(
            flops=2 * pn * d_model * pv,
            transcendentals=pn * pv,
            bytes_accessed=int(pn * d_model * x_bytes
                               + (pn // tm) * (d_model * pv * w_bytes + pv * 4)
                               + pn * pv * 4 + 2 * pn * 4),
        )
        logits, m, l = pl.pallas_call(
            _logits_stats_kernel,
            out_shape=(
                jax.ShapeDtypeStruct((pn, pv), jnp.float32),
                jax.ShapeDtypeStruct((pn, 1), jnp.float32),
                jax.ShapeDtypeStruct((pn, 1), jnp.float32),
            ),
            grid_spec=pltpu.PrefetchScalarGridSpec(
                num_scalar_prefetch=0,
                grid=grid,
                in_specs=[
                    pl.BlockSpec((tm, d_model), lambda i, j: (i, 0)),
                    pl.BlockSpec((d_model, tn), lambda i, j: (0, j)),
                    pl.BlockSpec((1, tn), lambda i, j: (0, j)),
                ],
                out_specs=(
                    pl.BlockSpec((tm, tn), lambda i, j: (i, j)),
                    pl.BlockSpec((tm, 1), lambda i, j: (i, 0)),
                    pl.BlockSpec((tm, 1), lambda i, j: (i, 0)),
                ),
                scratch_shapes=[pltpu.VMEM((tm, 1), jnp.float32),
                                pltpu.VMEM((tm, 1), jnp.float32)],
            ),
            compiler_params=pltpu.CompilerParams(
                dimension_semantics=("parallel", "arbitrary"),
                vmem_limit_bytes=vmem_cap,
            ),
            cost_estimate=cost1,
        )(x2, wt, b2)

        # ---- Pass 2: memory-bound rescale with lane-dense blocks (>= tn) ----
        fac = 1
        for cand in range(nj, 0, -1):
            if nj % cand:
                continue
            tn2c = tn * cand
            if (2 * tm * tn2c * (4 + out_bytes) + 4 * tm * 128 * 4) <= budget:
                fac = cand
                break
        tn2 = tn * fac
        alias = {0: 0} if jnp.dtype(out_dtype) == jnp.dtype(jnp.float32) else {}
        out = pl.pallas_call(
            _normalize_kernel,
            out_shape=jax.ShapeDtypeStruct((pn, pv), out_dtype),
            grid_spec=pltpu.PrefetchScalarGridSpec(
                num_scalar_prefetch=0,
                grid=(pn // tm, pv // tn2),
                in_specs=[
                    pl.BlockSpec((tm, tn2), lambda i, j: (i, j)),
                    pl.BlockSpec((tm, 1), lambda i, j: (i, 0)),
                    pl.BlockSpec((tm, 1), lambda i, j: (i, 0)),
                ],
                out_specs=pl.BlockSpec((tm, tn2), lambda i, j: (i, j)),
            ),
            compiler_params=pltpu.CompilerParams(
                dimension_semantics=("parallel", "parallel"),
                vmem_limit_bytes=vmem_cap,
            ),
            input_output_aliases=alias,
        )(logits, m, l)

    out = out[:n, :vocab]
    return out.reshape(orig_shape[:-1] + (vocab,))


# --------------------------------------------------------------------------- #
# Demo / self-check
# --------------------------------------------------------------------------- #
if __name__ == "__main__":
    batch, seq, d_model, vocab = 2, 8, 32, 128

    key = jax.random.PRNGKey(0)
    kx, kw, kb = jax.random.split(key, 3)

    # nn.Linear-style init (uniform(-1/sqrt(d_model), 1/sqrt(d_model))); the
    # PyTorch weight is (vocab, d_model), we keep its transpose (d_model, vocab).
    bound = 1.0 / math.sqrt(d_model)
    weight_t = jax.random.uniform(kw, (d_model, vocab), jnp.float32,
                                  minval=-bound, maxval=bound)
    bias = jax.random.uniform(kb, (vocab,), jnp.float32, minval=-bound, maxval=bound)
    x = jax.random.normal(kx, (batch, seq, d_model), jnp.float32)

    # Snap x / W to bf16-representable values so the XLA reference matmul and
    # the in-kernel MXU matmul agree to f32 rounding regardless of how many
    # bf16 passes each implementation uses.
    x = x.astype(jnp.bfloat16).astype(jnp.float32)
    weight_t = weight_t.astype(jnp.bfloat16).astype(jnp.float32)

    ref = jax.nn.softmax(x @ weight_t + bias, axis=-1)

    # Fused single-pass path (the one selected for these shapes).
    out = jax.block_until_ready(jax.jit(output_generator)(x, weight_t, bias))
    assert out.shape == (batch, seq, vocab)
    assert jnp.allclose(out, ref, atol=1e-4, rtol=1e-4)
    assert jnp.allclose(jnp.sum(out, axis=-1), 1.0, atol=1e-4)

    # Also exercise the large-vocab two-pass fallback on the same data.
    out2 = jax.block_until_ready(
        jax.jit(functools.partial(output_generator, force_two_pass=True))(x, weight_t, bias))
    assert out2.shape == (batch, seq, vocab)
    assert jnp.allclose(out2, ref, atol=1e-4, rtol=1e-4)

    print("KERNEL_OK")
</pallas_src>

<mosaic_0001>
module attributes {stable_mosaic.version = 11 : i64} {
  func.func @_fused_kernel(%arg0: i32, %arg1: i32, %arg2: memref<16x32xf32, #tpu.memory_space<vmem>>, %arg3: memref<32x128xf32, #tpu.memory_space<vmem>>, %arg4: memref<1x128xf32, #tpu.memory_space<vmem>>, %arg5: memref<16x128xf32, #tpu.memory_space<vmem>>, %arg6: memref<1x16x128xf32, #tpu.memory_space<vmem>>, %arg7: memref<1x16x1xf32, #tpu.memory_space<vmem>>, %arg8: memref<16x1xf32, #tpu.memory_space<vmem>>, %arg9: memref<16x1xf32, #tpu.memory_space<vmem>>) attributes {dimension_semantics = [#tpu.dimension_semantics<parallel>, #tpu.dimension_semantics<arbitrary>], iteration_bounds = array<i64: 1, 1>, scalar_prefetch = 0 : i64, scratch_operands = 4 : i64, tpu.core_type = #tpu.core_type<tc>, window_params = [{transform_indices = @transform_0, window_bounds = array<i64: 16, 32>}, {transform_indices = @transform_1, window_bounds = array<i64: 32, 128>}, {transform_indices = @transform_2, window_bounds = array<i64: 1, 128>}, {transform_indices = @transform_3, window_bounds = array<i64: 16, 128>}]} {
    %c0_i32 = arith.constant 0 : i32
    %0 = arith.cmpi eq, %arg1, %c0_i32 : i32
    %1 = arith.extui %0 : i1 to i32
    %c0_i32_0 = arith.constant 0 : i32
    %2 = arith.cmpi ne, %1, %c0_i32_0 : i32
    scf.if %2 {
      %cst_22 = arith.constant 0xFF800000 : f32
      %36 = vector.broadcast %cst_22 : f32 to vector<16x1xf32>
      %c0_23 = arith.constant 0 : index
      %c0_24 = arith.constant 0 : index
      %37 = vector.load %arg8[%c0_23, %c0_24] : memref<16x1xf32, #tpu.memory_space<vmem>>, vector<16x1xf32>
      tpu.vector_store %arg8[%c0_23, %c0_24], %36 {strides = array<i32>} : memref<16x1xf32, #tpu.memory_space<vmem>>, vector<16x1xf32>,
      %cst_25 = arith.constant 0.000000e+00 : f32
      %38 = vector.broadcast %cst_25 : f32 to vector<16x1xf32>
      %c0_26 = arith.constant 0 : index
      %c0_27 = arith.constant 0 : index
      %39 = vector.load %arg9[%c0_26, %c0_27] : memref<16x1xf32, #tpu.memory_space<vmem>>, vector<16x1xf32>
      tpu.vector_store %arg9[%c0_26, %c0_27], %38 {strides = array<i32>} : memref<16x1xf32, #tpu.memory_space<vmem>>, vector<16x1xf32>,
    } else {
    }
    %c0 = arith.constant 0 : index
    %c0_1 = arith.constant 0 : index
    %3 = vector.load %arg2[%c0, %c0_1] : memref<16x32xf32, #tpu.memory_space<vmem>>, vector<16x32xf32>
    %c0_2 = arith.constant 0 : index
    %c0_3 = arith.constant 0 : index
    %4 = vector.load %arg3[%c0_2, %c0_3] : memref<32x128xf32, #tpu.memory_space<vmem>>, vector<32x128xf32>
    %cst = arith.constant dense<0.000000e+00> : vector<16x128xf32>
    %5 = tpu.matmul %3, %4, %cst {dimension_numbers = #tpu.dot_dimension_numbers<[1], [0], [0], [1], [0, 0, 1, 1], [], []>} : vector<16x32xf32>, vector<32x128xf32>, vector<16x128xf32> -> vector<16x128xf32>
    %c0_4 = arith.constant 0 : index
    %c0_5 = arith.constant 0 : index
    %6 = vector.load %arg4[%c0_4, %c0_5] : memref<1x128xf32, #tpu.memory_space<vmem>>, vector<1x128xf32>
    %7 = vector.broadcast %6 : vector<1x128xf32> to vector<16x128xf32>
    %8 = arith.addf %5, %7 : vector<16x128xf32>
    %c0_6 = arith.constant 0 : index
    %c0_7 = arith.constant 0 : index
    %9 = vector.load %arg8[%c0_6, %c0_7] : memref<16x1xf32, #tpu.memory_space<vmem>>, vector<16x1xf32>
    %cst_8 = arith.constant dense<0xFF800000> : vector<16xf32>
    %10 = vector.multi_reduction <maximumf>, %8, %cst_8 [1] : vector<16x128xf32> to vector<16xf32>
    %11 = vector.shape_cast %10 : vector<16xf32> to vector<16x1xf32>
    %12 = arith.maximumf %9, %11 : vector<16x1xf32>
    %13 = vector.broadcast %12 : vector<16x1xf32> to vector<16x128xf32>
    %14 = arith.subf %8, %13 : vector<16x128xf32>
    %15 = math.exp %14 : vector<16x128xf32>
    %c0_9 = arith.constant 0 : index
    %c0_10 = arith.constant 0 : index
    %16 = vector.load %arg9[%c0_9, %c0_10] : memref<16x1xf32, #tpu.memory_space<vmem>>, vector<16x1xf32>
    %17 = arith.subf %9, %12 : vector<16x1xf32>
    %18 = math.exp %17 : vector<16x1xf32>
    %19 = arith.mulf %16, %18 : vector<16x1xf32>
    %cst_11 = arith.constant dense<0.000000e+00> : vector<16xf32>
    %20 = vector.multi_reduction <add>, %15, %cst_11 [1] : vector<16x128xf32> to vector<16xf32>
    %21 = vector.shape_cast %20 : vector<16xf32> to vector<16x1xf32>
    %22 = arith.addf %19, %21 : vector<16x1xf32>
    %c0_12 = arith.constant 0 : index
    %c0_13 = arith.constant 0 : index
    %23 = vector.load %arg9[%c0_12, %c0_13] : memref<16x1xf32, #tpu.memory_space<vmem>>, vector<16x1xf32>
    tpu.vector_store %arg9[%c0_12, %c0_13], %22 {strides = array<i32>} : memref<16x1xf32, #tpu.memory_space<vmem>>, vector<16x1xf32>,
    %c0_14 = arith.constant 0 : index
    %c0_15 = arith.constant 0 : index
    %24 = vector.load %arg8[%c0_14, %c0_15] : memref<16x1xf32, #tpu.memory_space<vmem>>, vector<16x1xf32>
    tpu.vector_store %arg8[%c0_14, %c0_15], %12 {strides = array<i32>} : memref<16x1xf32, #tpu.memory_space<vmem>>, vector<16x1xf32>,
    %25 = arith.index_cast %arg1 : i32 to index
    %c0_16 = arith.constant 0 : index
    %c0_17 = arith.constant 0 : index
    %26 = vector.load %arg6[%25, %c0_16, %c0_17] : memref<1x16x128xf32, #tpu.memory_space<vmem>>, vector<1x16x128xf32>
    %27 = vector.shape_cast %26 : vector<1x16x128xf32> to vector<16x128xf32>
    %28 = vector.shape_cast %15 : vector<16x128xf32> to vector<1x16x128xf32>
    tpu.vector_store %arg6[%25, %c0_16, %c0_17], %28 {strides = array<i32>} : memref<1x16x128xf32, #tpu.memory_space<vmem>>, vector<1x16x128xf32>,
    %29 = arith.index_cast %arg1 : i32 to index
    %c0_18 = arith.constant 0 : index
    %c0_19 = arith.constant 0 : index
    %30 = vector.load %arg7[%29, %c0_18, %c0_19] : memref<1x16x1xf32, #tpu.memory_space<vmem>>, vector<1x16x1xf32>
    %31 = vector.shape_cast %30 : vector<1x16x1xf32> to vector<16x1xf32>
    %32 = vector.shape_cast %12 : vector<16x1xf32> to vector<1x16x1xf32>
    tpu.vector_store %arg7[%29, %c0_18, %c0_19], %32 {strides = array<i32>} : memref<1x16x1xf32, #tpu.memory_space<vmem>>, vector<1x16x1xf32>,
    %c0_i32_20 = arith.constant 0 : i32
    %33 = arith.cmpi eq, %arg1, %c0_i32_20 : i32
    %34 = arith.extui %33 : i1 to i32
    %c0_i32_21 = arith.constant 0 : i32
    %35 = arith.cmpi ne, %34, %c0_i32_21 : i32
    scf.if %35 {
      %c0_22 = arith.constant 0 : index
      %c0_23 = arith.constant 0 : index
      %36 = vector.load %arg8[%c0_22, %c0_23] : memref<16x1xf32, #tpu.memory_space<vmem>>, vector<16x1xf32>
      %c0_24 = arith.constant 0 : index
      %c0_25 = arith.constant 0 : index
      %37 = vector.load %arg9[%c0_24, %c0_25] : memref<16x1xf32, #tpu.memory_space<vmem>>, vector<16x1xf32>
      %38 = tpu.reciprocal %37 : vector<16x1xf32> -> vector<16x1xf32>
      %c0_26 = arith.constant 0 : index
      %c0_27 = arith.constant 0 : index
      %c0_28 = arith.constant 0 : index
      %39 = vector.load %arg7[%c0_26, %c0_27, %c0_28] : memref<1x16x1xf32, #tpu.memory_space<vmem>>, vector<1x16x1xf32>
      %40 = vector.shape_cast %39 : vector<1x16x1xf32> to vector<16x1xf32>
      %41 = arith.subf %40, %36 : vector<16x1xf32>
      %42 = math.exp %41 : vector<16x1xf32>
      %43 = arith.mulf %42, %38 : vector<16x1xf32>
      %c0_29 = arith.constant 0 : index
      %c0_30 = arith.constant 0 : index
      %c0_31 = arith.constant 0 : index
      %44 = vector.load %arg6[%c0_29, %c0_30, %c0_31] : memref<1x16x128xf32, #tpu.memory_space<vmem>>, vector<1x16x128xf32>
      %45 = vector.shape_cast %44 : vector<1x16x128xf32> to vector<16x128xf32>
      %46 = vector.broadcast %43 : vector<16x1xf32> to vector<16x128xf32>
      %47 = arith.mulf %45, %46 : vector<16x128xf32>
      %c0_32 = arith.constant 0 : index
      %c0_33 = arith.constant 0 : index
      %48 = vector.load %arg5[%c0_32, %c0_33] : memref<16x128xf32, #tpu.memory_space<vmem>>, vector<16x128xf32>
      tpu.vector_store %arg5[%c0_32, %c0_33], %47 {strides = array<i32>} : memref<16x128xf32, #tpu.memory_space<vmem>>, vector<16x128xf32>,
    } else {
    }
    return
  }
  func.func @transform_0(%arg0: i32, %arg1: i32) -> (i32, i32) {
    %c0_i32 = arith.constant 0 : i32
    %c0_i32_0 = arith.constant 0 : i32
    return %arg0, %c0_i32 : i32, i32
  }
  func.func @transform_1(%arg0: i32, %arg1: i32) -> (i32, i32) {
    %c0_i32 = arith.constant 0 : i32
    %c0_i32_0 = arith.constant 0 : i32
    return %c0_i32, %arg1 : i32, i32
  }
  func.func @transform_2(%arg0: i32, %arg1: i32) -> (i32, i32) {
    %c0_i32 = arith.constant 0 : i32
    %c0_i32_0 = arith.constant 0 : i32
    return %c0_i32, %arg1 : i32, i32
  }
  func.func @transform_3(%arg0: i32, %arg1: i32) -> (i32, i32) {
    %c0_i32 = arith.constant 0 : i32
    %c0_i32_0 = arith.constant 0 : i32
    return %arg0, %c0_i32 : i32, i32
  }
}

</mosaic_0001>

<bundles_post_ra>
// kernel: output_generator.1
= control target key start
LH: loop header
LB: loop body
LE: loop exit
PB: predicated region body
PF: predicated region fallthrough
CT: control target
= control target key end

     0   :  { %8 = vsyncpa [#allocation7], 0  ;;  %s425_s0 = inlined_call_operand.hbm [shape: f32[16,32], index: 0, kind: input, shape index: {}]   ;;  %s426_s1 = inlined_call_operand.hbm [shape: f32[32,128], index: 1, kind: input, shape index: {}]   ;;  %s427_s2 = inlined_call_operand.vmem [shape: f32[1,128], index: 2, kind: input, shape index: {}]   ;;  %s428_s3 = inlined_call_operand.hbm [shape: f32[16,128], index: 3, kind: output, shape index: {}]  }
   0x1   :  { %9 = vsyncpa [#allocation10], 0 }
   0x2   :  { %10 = vsyncpa [#allocation8], 0  ;;  %s364_s12 = smov [#allocation6]  }
   0x3   :  { %s16_s13 = sshll.u32 %s364_s12, 4  ;;  %s17_s13 = int_to_ptr.vmem [resolvable:$true] %s16_s13 }
   0x4   :  { %s306_s14 = scalar_lea.vmem %s17_s13, 256  ;;  %p311_p1 = scmp.lt.s32.totalorder %s17_s13, %s17_s13 }
   0x5   :  { %p307_p0 = scmp.ne.s32.totalorder %s17_s13, %s306_s14  ;;  %p312_p2 = scmp.lt.s32.totalorder %s306_s14, %s306_s14 }
   0x7   :  { %p313_p3 = por %p312_p2, %p311_p1 }
   0x9   :  { %p314_p4 = pnand %p313_p3, %p307_p0 }
   0xb   :  { %317 = shalt.err (!%p314_p4)
}
   0xc   :  { %s365_s15 = smov 128   ;;  %s366_s16 = smov 8  }
   0xd   :  { %22 = dma.hbm_to_vmem [thread:$0]  %s425_s0, 256, %s17_s13, [#allocation7], %s365_s15, %s365_s15, %s366_s16  }
   0xe   :  { %s367_s19 = smov [#allocation9]  }
   0xf   :  { %s28_s20 = sshll.u32 %s367_s19, 4  ;;  %s29_s20 = int_to_ptr.vmem [resolvable:$true] %s28_s20 }
  0x10   :  { %s326_s21 = scalar_lea.vmem %s29_s20, 512  ;;  %p331_p6 = scmp.lt.s32.totalorder %s29_s20, %s29_s20 }
  0x11   :  { %p327_p5 = scmp.ne.s32.totalorder %s29_s20, %s326_s21  ;;  %p332_p7 = scmp.lt.s32.totalorder %s326_s21, %s326_s21 }
  0x13   :  { %p333_p8 = por %p332_p7, %p331_p6 }
  0x15   :  { %p334_p9 = pnand %p333_p8, %p327_p5 }
  0x17   :  { %337 = shalt.err (!%p334_p9)
}
  0x18   :  { %34 = dma.hbm_to_vmem [thread:$0]  %s426_s1, 512, %s29_s20, [#allocation10], %s365_s15, %s365_s15, %s366_s16  }
  0x19   :  { %358 = dma.done.wait [#allocation7], 256  }
  0x1a   :  { %359 = vsyncadd [#allocation7], 4294967040 }
  0x1b   :  { %360 = dma.done.wait [#allocation10], 512  }
  0x1c   :  { %361 = vsyncadd [#allocation10], 4294966784  ;;  %vm65_vm0 = vcmask 261120   ;;  %v57_v0 = vld [vmem:[#allocation9 + $0x18] sm:$0xff]  ;;  %v56_v1 = vld [vmem:[#allocation9 + $0x10] sm:$0xff]  ;;  %vm47_vm1 = vcmask 7168  }
  0x1d   :  { %261 = vmatprep.subr.mxu0 %v57_v0  ;;  %v52_v2 = vld [vmem:[#allocation6] sm:$0xff]  ;;  %v55_v3 = vld [vmem:[#allocation9 + $0x8] sm:$0xff]  ;;  %v54_v4 = vld [vmem:[#allocation9] sm:$0xff]  ;;  %v368_v6 = vmov -inf   ;;  %v369_v12 = vmov 0   ;;  %v370_v13 = vmov 0.0  }
  0x1e   :  { %262 = vmatpush3.msra.mxu0 %v57_v0  ;;  %269 = vmatprep.mubr.msk.f32.mxu0 %vm65_vm0, %v52_v2  ;;  %v53_v5 = vld [vmem:[#allocation6 + $0x8] sm:$0xff]  ;;  %48 = vst.msk [vmem:[#allocation4] sm:$0xff] %vm47_vm1, %v368_v6  ;;  %49 = vst.msk [vmem:[#allocation4 + $0x8] sm:$0xff] %vm47_vm1, %v368_v6  ;;  %v252_v8 = vld [vmem:[%s427_s2] ss:$0 sm:$0xff]  ;;  %s371_s2 = smov [#allocation11]  }
  0x1f   :  { %263 = vmatprep.subr.mxu0 %v56_v1  ;;  %280 = vset.pattern.permute.xlu1 %v369_v12  ;;  %50 = vst.msk [vmem:[#allocation5] sm:$0xff] %vm47_vm1, %v370_v13  ;;  %51 = vst.msk [vmem:[#allocation5 + $0x8] sm:$0xff] %vm47_vm1, %v370_v13  ;;  %s239_s24 = sshll.u32 %s371_s2, 4  ;;  %s240_s24 = int_to_ptr.vmem [resolvable:$true] %s239_s24 }
  0x20   :  { %264 = vmatpush3.msra.mxu0 %v56_v1  ;;  %281 = vset.pattern.permute.xlu0 %v369_v12  ;;  %s338_s25 = scalar_lea.vmem %s240_s24, 256  ;;  %p343_p11 = scmp.lt.s32.totalorder %s240_s24, %s240_s24 }
  0x21   :  { %265 = vmatprep.subr.mxu0 %v55_v3  ;;  %p339_p10 = scmp.ne.s32.totalorder %s240_s24, %s338_s25  ;;  %p344_p12 = scmp.lt.s32.totalorder %s338_s25, %s338_s25 }
  0x22   :  { %266 = vmatpush3.msra.mxu0 %v55_v3 }
  0x23   :  { %267 = vmatprep.subr.mxu0 %v54_v4  ;;  %p345_p13 = por %p344_p12, %p343_p11 }
  0x24   :  { %268 = vmatpush3.msra.mxu0 %v54_v4 }
  0x25   :  { %270 = vmatmul.mubr.msk.f32.vlgmr.msra.gmra.mxu0 %vm65_vm0, %v53_v5  ;;  %v147_v14 = vld [vmem:[#allocation4] sm:$0xff]  ;;  %v148_v17 = vld [vmem:[#allocation4 + $0x8] sm:$0xff]  ;;  %p346_p0 = pnand %p345_p13, %p339_p10 }
  0x26   :  { %v171_v33 = vld [vmem:[#allocation5] sm:$0xff]  ;;  %v172_v39 = vld [vmem:[#allocation5 + $0x8] sm:$0xff] }
  0xe5   :  { %v271_v7 = vpop.f32.mrf.mxu0 }
  0xe6   :  { %v144_v11 = vadd.f32 %v271_v7, %v252_v8 }
  0xe7   :  { %v138_v9 = vpop.f32.mrf.mxu0 }
  0xe8   :  { %v139_v10 = vadd.f32 %v252_v8, %v138_v9 }
  0xea   :  { %149 = vmax.xlane.f32.xlu0 %v139_v10 }
  0xee   :  { %151 = vmax.xlane.f32.xlu0 %v144_v11 }
 0x173   :  { %v150_v15 = vpop.xlane.xlu0 %149 }
 0x174   :  { %v153_v16 = vmax.f32 %v147_v14, %v150_v15 }
 0x176   :  { %v173_v18 = vsub.f32 %v147_v14, %v153_v16  ;;  %190 = vst.msk [vmem:[#allocation4] sm:$0xff] %vm47_vm1, %v153_v16  ;;  %197 = vst.msk [vmem:[#allocation3] sm:$0xff] %vm47_vm1, %v153_v16  ;;  %157 = vperm.xlu1 %280, %v153_v16  }
 0x177   :  { %v152_v19 = vpop.xlane.xlu0 %151 }
 0x178   :  { %v154_v20 = vmax.f32 %v148_v17, %v152_v19  ;;  %v175_v30 = vmul.f32 1.442695, %v173_v18 }
 0x17a   :  { %v174_v21 = vsub.f32 %v148_v17, %v154_v20  ;;  %191 = vst.msk [vmem:[#allocation4 + $0x8] sm:$0xff] %vm47_vm1, %v154_v20  ;;  %198 = vst.msk [vmem:[#allocation3 + $0x8] sm:$0xff] %vm47_vm1, %v154_v20  ;;  %162 = vperm.xlu1 %280, %v154_v20  }
 0x17c   :  { %v177_v31 = vmul.f32 1.442695, %v174_v21 }
 0x17d   :  { %v202_v35 = vld [vmem:[#allocation4] sm:$0xff]  ;;  %v208_v36 = vld [vmem:[#allocation3] sm:$0xff] }
 0x17e   :  { %v210_v41 = vsub.f32 %v208_v36, %v202_v35 }
 0x180   :  { %v212_v47 = vmul.f32 1.442695, %v210_v41 }
 0x181   :  { %v203_v43 = vld [vmem:[#allocation4 + $0x8] sm:$0xff]  ;;  %v209_v44 = vld [vmem:[#allocation3 + $0x8] sm:$0xff] }
 0x182   :  { %v211_v48 = vsub.f32 %v209_v44, %v203_v43 }
 0x184   :  { %v214_v50 = vmul.f32 1.442695, %v211_v48 }
 0x1f1   :  { %v158_v22 = vpop.permute.xlu1 %157 }
 0x1f2   :  { %v165_v23 = vsub.f32 %v139_v10, %v158_v22 }
 0x1f4   :  { %v167_v24 = vmul.f32 1.442695, %v165_v23 }
 0x1f5   :  { %v163_v25 = vpop.permute.xlu1 %162 }
 0x1f6   :  { %282 = vpow2.f32 %v167_v24  ;;  %v166_v26 = vsub.f32 %v144_v11, %v163_v25 }
 0x1f8   :  { %v169_v27 = vmul.f32 1.442695, %v166_v26 }
 0x1fa   :  { %284 = vpow2.f32 %v169_v27 }
 0x1fb   :  { %286 = vpow2.f32 %v175_v30 }
 0x1fc   :  { %288 = vpow2.f32 %v177_v31 }
 0x1fd   :  { %290 = vpow2.f32 %v212_v47 }
 0x203   :  { %v283_v28 = vpop.eup %282 }
 0x204   :  { %181 = vadd.xlane.f32.xlu0 %v283_v28 }
 0x207   :  { %v285_v29 = vpop.eup %284 }
 0x208   :  { %183 = vadd.xlane.f32.xlu1 %v285_v29  ;;  %v287_v32 = vpop.eup %286 }
 0x209   :  { %v179_v34 = vmul.f32 %v287_v32, %v171_v33  ;;  %v289_v37 = vpop.eup %288 }
 0x20a   :  { %v180_v42 = vmul.f32 %v289_v37, %v172_v39  ;;  %v291_v52 = vpop.eup %290 }
 0x28d   :  { %v182_v38 = vpop.xlane.xlu0 %181 }
 0x28e   :  { %v185_v40 = vadd.f32 %v182_v38, %v179_v34 }
 0x290   :  { %188 = vst.msk [vmem:[#allocation5] sm:$0xff] %vm47_vm1, %v185_v40 }
 0x291   :  { %v184_v45 = vpop.xlane.xlu1 %183 }
 0x292   :  { %v186_v46 = vadd.f32 %v184_v45, %v180_v42 }
 0x294   :  { %189 = vst.msk [vmem:[#allocation5 + $0x8] sm:$0xff] %vm47_vm1, %v186_v46 }
 0x297   :  { %v204_v49 = vld [vmem:[#allocation5] sm:$0xff] }
 0x298   :  { %292 = vrcp.f32 %v204_v49 }
 0x299   :  { %294 = vpow2.f32 %v214_v50 }
 0x29b   :  { %v205_v51 = vld [vmem:[#allocation5 + $0x8] sm:$0xff] }
 0x29c   :  { %296 = vrcp.f32 %v205_v51 }
 0x2a5   :  { %v293_v53 = vpop.eup %292 }
 0x2a6   :  { %v216_v54 = vmul.f32 %v293_v53, %v291_v52  ;;  %v295_v55 = vpop.eup %294 }
 0x2a8   :  { %222 = vperm.xlu0 %281, %v216_v54  }
 0x2a9   :  { %v297_v56 = vpop.eup %296 }
 0x2aa   :  { %v217_v57 = vmul.f32 %v297_v56, %v295_v55 }
 0x2ac   :  { %227 = vperm.xlu1 %280, %v217_v57  }
 0x323   :  { %v223_v58 = vpop.permute.xlu0 %222 }
 0x324   :  { %v230_v59 = vmul.f32 %v283_v28, %v223_v58 }
 0x326   :  { %232 = vst [vmem:[#allocation11] sm:$0xff] %v230_v59 }
 0x327   :  { %v228_v60 = vpop.permute.xlu1 %227 }
 0x328   :  { %v231_v61 = vmul.f32 %v285_v29, %v228_v60 }
 0x32a   :  { %233 = vst [vmem:[#allocation11 + $0x8] sm:$0xff] %v231_v61 }
 0x32b   :  { %349 = shalt.err (!%p346_p0)
}
 0x32c   :  { %245 = dma.vmem_to_hbm [thread:$0]  %s240_s24, 256, %s428_s3, [#allocation8], %s365_s15, %s365_s15, %s366_s16  }
 0x32d   :  { %362 = dma.done.wait [#allocation8], 256  }
 0x32e   :  { %363 = vsyncadd [#allocation8], 4294967040 }
 0x32f   :  { %249 = vsyncpa [#allocation7], 1 }
 0x330   :  { %250 = vsyncpa [#allocation10], 1 }
 0x331   :  { %251 = vsyncpa [#allocation8], 1 }

</bundles_post_ra>
